<compile_context>
chip_gen: v5e
topology: v5e:2x2
jax: 0.10.0
libtpu: 0.0.40
codegen_flags: <defaults>
</compile_context>

<pallas_src>
import functools

import jax
import jax.numpy as jnp
from jax.experimental import pallas as pl
from jax.experimental.pallas import tpu as pltpu


def _round_up(x, m):
    return ((x + m - 1) // m) * m


def _pick_hw_tile(hw, target=2048):
    """Largest multiple-of-128 divisor of hw that is <= target (else all of hw)."""
    if hw <= target or hw % 128 != 0:
        return hw
    best = 128
    for t in range(128, target + 1, 128):
        if hw % t == 0:
            best = t
    return best


# --------------------------------------------------------------------------- #
# Pass 1: backbone stand-in (pointwise stem + hard-swish + global average pool)
# --------------------------------------------------------------------------- #
def _backbone_kernel(x_ref, w_stem_ref, b_stem_ref, feat_ref, acc_ref, *, inv_hw):
    # x_ref:      (bt, C, hw_t)   image chunk, spatial on the lane axis (NCHW kept, no transpose)
    # w_stem_ref: (F, C)          pointwise "stem" conv weight (F on sublanes)
    # b_stem_ref: (F, 1)
    # feat_ref:   (bt, F) bf16    pooled features (written on the last spatial step)
    # acc_ref:    (bt, F) f32     running spatial sum (scratch)
    s = pl.program_id(1)                 # spatial-chunk axis (innermost, "arbitrary")
    bt, C, hw_t = x_ref.shape
    F = w_stem_ref.shape[0]

    @pl.when(s == 0)
    def _():
        acc_ref[...] = jnp.zeros_like(acc_ref)

    x = x_ref[...]                       # [bt, C, hw_t] f32
    ws = w_stem_ref[...]                 # [F, C]
    # Bias broadcast hoisted once; K=C contraction is tiny -> C unrolled VPU FMAs.
    h = jnp.broadcast_to(b_stem_ref[...][None, :, :], (bt, F, hw_t))
    for c in range(C):
        h = h + ws[:, c:c + 1][None, :, :] * x[:, c, :][:, None, :]
    # hard-swish (MobileNetV3 activation), f32 on the VPU (v5e-safe)
    h = h * jnp.clip(h + 3.0, 0.0, 6.0) * (1.0 / 6.0)
    # partial global-average-pool: lane-axis reduce, accumulate in f32
    acc_ref[...] += jnp.sum(h, axis=-1)

    @pl.when(s == pl.num_programs(1) - 1)
    def _():
        feat_ref[...] = (acc_ref[...] * inv_hw).astype(feat_ref.dtype)


# --------------------------------------------------------------------------- #
# Pass 2: fc head — [bt, F] @ [F, tn] with the big classifier weight streamed bf16
# --------------------------------------------------------------------------- #
def _fc_kernel(feat_ref, w_fc_ref, b_fc_ref, out_ref):
    # feat_ref: (bt, F) bf16 | w_fc_ref: (F, tn) bf16 | b_fc_ref: (1, tn) f32
    # out_ref:  (bt, tn) f32 lane-dense logits block
    out_ref[...] = (
        jnp.dot(feat_ref[...], w_fc_ref[...], preferred_element_type=jnp.float32)
        + b_fc_ref[...]
    )


def landmark_retrieval_forward(x_nchw, w_stem, b_stem, w_fc, b_fc, *,
                               tn=512, bt=None, hw_tile=None):
    """x_nchw: [B, C, H, W] f32.  w_stem: [C, F], b_stem: [1, F],
    w_fc: [F, NC], b_fc: [1, NC].  Returns logits [B, NC] f32."""
    B, C, H, W = x_nchw.shape
    Cw, F = w_stem.shape
    assert Cw == C
    Fw, NC = w_fc.shape
    assert Fw == F
    HW = H * W

    # ---- tile selection ----------------------------------------------------
    if bt is None:
        bt = B if B <= 128 else 128               # more MXU rows, fewer grid steps
    B_pad = _round_up(B, bt)
    b_tiles = B_pad // bt

    if hw_tile is None:
        hw_tile = _pick_hw_tile(HW)
    assert HW % hw_tile == 0 and (hw_tile == HW or hw_tile % 128 == 0)
    hw_tiles = HW // hw_tile

    tn = min(tn, _round_up(NC, 128))              # avoid gross padding for tiny heads
    NC_pad = _round_up(NC, tn)
    nc_tiles = NC_pad // tn

    # ---- input prep (free layout change: NCHW -> [B, C, H*W], HW lane-dense) ----
    x_p = x_nchw.reshape(B, C, HW)
    if B_pad != B:
        x_p = jnp.pad(x_p, ((0, B_pad - B), (0, 0), (0, 0)))
    w_stem_t = jnp.transpose(w_stem)              # (F, C)
    b_stem_c = b_stem.reshape(F, 1)

    # ---- pass 1: backbone -> pooled features [B_pad, F] bf16 ----------------
    bb_cost = pl.CostEstimate(
        flops=int(2 * B_pad * C * HW * F + 4 * B_pad * F * HW),
        transcendentals=0,
        bytes_accessed=int(B_pad * C * HW * 4 + F * C * 4 + F * 4 + B_pad * F * 2),
    )
    feats = pl.pallas_call(
        functools.partial(_backbone_kernel, inv_hw=1.0 / HW),
        out_shape=jax.ShapeDtypeStruct((B_pad, F), jnp.bfloat16),
        grid_spec=pltpu.PrefetchScalarGridSpec(
            num_scalar_prefetch=0,
            grid=(b_tiles, hw_tiles),                              # spatial reduction innermost
            in_specs=[
                pl.BlockSpec((bt, C, hw_tile), lambda i, s: (i, 0, s)),  # image chunk (read once)
                pl.BlockSpec((F, C),           lambda i, s: (0, 0)),     # stem weight (resident)
                pl.BlockSpec((F, 1),           lambda i, s: (0, 0)),     # stem bias (resident)
            ],
            out_specs=pl.BlockSpec((bt, F), lambda i, s: (i, 0)),
            scratch_shapes=[pltpu.VMEM((bt, F), jnp.float32)],           # pooled-sum accumulator
        ),
        compiler_params=pltpu.CompilerParams(
            dimension_semantics=("parallel", "arbitrary")),
        cost_estimate=bb_cost,
    )(x_p, w_stem_t, b_stem_c)

    # ---- pass 2: fc head, classifier weight streamed in bf16 ----------------
    w_fc_p = w_fc
    b_fc_p = b_fc.reshape(1, NC)
    if NC_pad != NC:
        w_fc_p = jnp.pad(w_fc_p, ((0, 0), (0, NC_pad - NC)))
        b_fc_p = jnp.pad(b_fc_p, ((0, 0), (0, NC_pad - NC)))
    w_fc_p = w_fc_p.astype(jnp.bfloat16)          # halves HBM traffic; accumulate f32

    fc_cost = pl.CostEstimate(
        flops=int(2 * B_pad * F * NC_pad),
        transcendentals=0,
        bytes_accessed=int(B_pad * F * 2 * nc_tiles + F * NC_pad * 2
                           + NC_pad * 4 + B_pad * NC_pad * 4),
    )
    out = pl.pallas_call(
        _fc_kernel,
        out_shape=jax.ShapeDtypeStruct((B_pad, NC_pad), jnp.float32),
        grid_spec=pltpu.PrefetchScalarGridSpec(
            num_scalar_prefetch=0,
            # NC outer / batch inner: the (F, tn) weight tile stays resident across
            # the whole batch loop, so each weight byte is read exactly once.
            grid=(nc_tiles, b_tiles),
            in_specs=[
                pl.BlockSpec((bt, F), lambda j, i: (i, 0)),    # pooled features (tiny)
                pl.BlockSpec((F, tn), lambda j, i: (0, j)),    # fc weight tile (streamed)
                pl.BlockSpec((1, tn), lambda j, i: (0, j)),    # fc bias tile
            ],
            out_specs=pl.BlockSpec((bt, tn), lambda j, i: (i, j)),   # lane-dense logits block
        ),
        compiler_params=pltpu.CompilerParams(
            # No cross-step state -> both axes independent; on v7x megacore the NC
            # axis is sharded across the two TensorCores (disjoint halves of w_fc).
            dimension_semantics=("parallel", "parallel")),
        cost_estimate=fc_cost,
    )(feats, w_fc_p, b_fc_p)

    return out[:B, :NC]


if __name__ == "__main__":
    # Small shapes consistent with the module's forward:
    #   batch=2, in_channels=3 (RGB), spatial=16x16,
    #   n_features=128 (stand-in for MobileNetV3-Small's 1024),
    #   num_classes=1000 (stand-in for CONFIG['num_classes']=81313; exercises NC padding).
    B, C, H, W = 2, 3, 16, 16
    F, NUM_CLASSES = 128, 1000

    key = jax.random.PRNGKey(0)
    kx, k1, k2, k3, k4 = jax.random.split(key, 5)

    x = jax.random.normal(kx, (B, C, H, W), jnp.float32)
    w_stem = jax.random.normal(k1, (C, F), jnp.float32) * 0.1
    b_stem = jax.random.normal(k2, (1, F), jnp.float32) * 0.01
    w_fc = jax.random.normal(k3, (F, NUM_CLASSES), jnp.float32) * (1.0 / jnp.sqrt(F))
    b_fc = jax.random.normal(k4, (1, NUM_CLASSES), jnp.float32) * 0.01

    # hw_tile=128 exercises the spatial-accumulation path (HW=256 -> 2 chunks).
    logits = landmark_retrieval_forward(x, w_stem, b_stem, w_fc, b_fc,
                                        tn=512, hw_tile=128)
    jax.block_until_ready(logits)

    assert logits.shape == (B, NUM_CLASSES), logits.shape
    assert logits.dtype == jnp.float32

    # Pure-JAX reference with the same stand-in backbone semantics.
    x_f = x.reshape(B, C, H * W)
    h_ref = jnp.einsum("cf,bcp->bfp", w_stem, x_f) + b_stem.reshape(1, F, 1)
    h_ref = h_ref * jnp.clip(h_ref + 3.0, 0.0, 6.0) / 6.0
    feat_ref = jnp.mean(h_ref, axis=-1).astype(jnp.bfloat16)
    ref = jnp.dot(feat_ref, w_fc.astype(jnp.bfloat16),
                  preferred_element_type=jnp.float32) + b_fc
    assert jnp.allclose(logits, ref, rtol=2e-2, atol=2e-2), \
        float(jnp.max(jnp.abs(logits - ref)))

    print("KERNEL_OK")
</pallas_src>

<mosaic_0001>
module attributes {stable_mosaic.version = 11 : i64} {
  func.func @_backbone_kernel(%arg0: i32, %arg1: i32, %arg2: memref<2x3x128xf32, #tpu.memory_space<vmem>>, %arg3: memref<128x3xf32, #tpu.memory_space<vmem>>, %arg4: memref<128x1xf32, #tpu.memory_space<vmem>>, %arg5: memref<2x128xbf16, #tpu.memory_space<vmem>>, %arg6: memref<2x128xf32, #tpu.memory_space<vmem>>) attributes {dimension_semantics = [#tpu.dimension_semantics<parallel>, #tpu.dimension_semantics<arbitrary>], iteration_bounds = array<i64: 1, 2>, scalar_prefetch = 0 : i64, scratch_operands = 1 : i64, tpu.core_type = #tpu.core_type<tc>, window_params = [{transform_indices = @transform_0, window_bounds = array<i64: 2, 3, 128>}, {pipeline_mode = #tpu.pipeline_mode<synchronous>, transform_indices = @transform_1, window_bounds = array<i64: 128, 3>}, {pipeline_mode = #tpu.pipeline_mode<synchronous>, transform_indices = @transform_2, window_bounds = array<i64: 128, 1>}, {transform_indices = @transform_3, window_bounds = array<i64: 2, 128>}]} {
    %c0_i32 = arith.constant 0 : i32
    %0 = arith.cmpi eq, %arg1, %c0_i32 : i32
    %1 = arith.extui %0 : i1 to i32
    %c0_i32_0 = arith.constant 0 : i32
    %2 = arith.cmpi ne, %1, %c0_i32_0 : i32
    scf.if %2 {
      %cst_16 = arith.constant 0.000000e+00 : f32
      %52 = vector.broadcast %cst_16 : f32 to vector<2x128xf32>
      %c0_17 = arith.constant 0 : index
      %c0_18 = arith.constant 0 : index
      %53 = vector.load %arg6[%c0_17, %c0_18] : memref<2x128xf32, #tpu.memory_space<vmem>>, vector<2x128xf32>
      tpu.vector_store %arg6[%c0_17, %c0_18], %52 {strides = array<i32>} : memref<2x128xf32, #tpu.memory_space<vmem>>, vector<2x128xf32>,
    } else {
    }
    %c0 = arith.constant 0 : index
    %c0_1 = arith.constant 0 : index
    %c0_2 = arith.constant 0 : index
    %3 = vector.load %arg2[%c0, %c0_1, %c0_2] : memref<2x3x128xf32, #tpu.memory_space<vmem>>, vector<2x3x128xf32>
    %c0_3 = arith.constant 0 : index
    %c0_4 = arith.constant 0 : index
    %4 = vector.load %arg3[%c0_3, %c0_4] : memref<128x3xf32, #tpu.memory_space<vmem>>, vector<128x3xf32>
    %c0_5 = arith.constant 0 : index
    %c0_6 = arith.constant 0 : index
    %5 = vector.load %arg4[%c0_5, %c0_6] : memref<128x1xf32, #tpu.memory_space<vmem>>, vector<128x1xf32>
    %6 = vector.shape_cast %5 : vector<128x1xf32> to vector<1x128x1xf32>
    %7 = vector.shape_cast %6 : vector<1x128x1xf32> to vector<1x128x1xf32>
    %8 = vector.broadcast %7 : vector<1x128x1xf32> to vector<2x128x128xf32>
    %9 = vector.extract_strided_slice %4 {offsets = [0, 0], sizes = [128, 1], strides = [1, 1]} : vector<128x3xf32> to vector<128x1xf32>
    %10 = vector.shape_cast %9 : vector<128x1xf32> to vector<1x128x1xf32>
    %11 = vector.extract_strided_slice %3 {offsets = [0, 0, 0], sizes = [2, 1, 128], strides = [1, 1, 1]} : vector<2x3x128xf32> to vector<2x1x128xf32>
    %12 = vector.shape_cast %11 : vector<2x1x128xf32> to vector<2x128xf32>
    %13 = vector.shape_cast %12 : vector<2x128xf32> to vector<2x1x128xf32>
    %14 = vector.broadcast %10 : vector<1x128x1xf32> to vector<2x128x128xf32>
    %15 = vector.broadcast %13 : vector<2x1x128xf32> to vector<2x128x128xf32>
    %16 = arith.mulf %14, %15 : vector<2x128x128xf32>
    %17 = arith.addf %8, %16 : vector<2x128x128xf32>
    %18 = vector.extract_strided_slice %4 {offsets = [0, 1], sizes = [128, 1], strides = [1, 1]} : vector<128x3xf32> to vector<128x1xf32>
    %19 = vector.shape_cast %18 : vector<128x1xf32> to vector<1x128x1xf32>
    %20 = vector.extract_strided_slice %3 {offsets = [0, 1, 0], sizes = [2, 1, 128], strides = [1, 1, 1]} : vector<2x3x128xf32> to vector<2x1x128xf32>
    %21 = vector.shape_cast %20 : vector<2x1x128xf32> to vector<2x128xf32>
    %22 = vector.shape_cast %21 : vector<2x128xf32> to vector<2x1x128xf32>
    %23 = vector.broadcast %19 : vector<1x128x1xf32> to vector<2x128x128xf32>
    %24 = vector.broadcast %22 : vector<2x1x128xf32> to vector<2x128x128xf32>
    %25 = arith.mulf %23, %24 : vector<2x128x128xf32>
    %26 = arith.addf %17, %25 : vector<2x128x128xf32>
    %27 = vector.extract_strided_slice %4 {offsets = [0, 2], sizes = [128, 1], strides = [1, 1]} : vector<128x3xf32> to vector<128x1xf32>
    %28 = vector.shape_cast %27 : vector<128x1xf32> to vector<1x128x1xf32>
    %29 = vector.extract_strided_slice %3 {offsets = [0, 2, 0], sizes = [2, 1, 128], strides = [1, 1, 1]} : vector<2x3x128xf32> to vector<2x1x128xf32>
    %30 = vector.shape_cast %29 : vector<2x1x128xf32> to vector<2x128xf32>
    %31 = vector.shape_cast %30 : vector<2x128xf32> to vector<2x1x128xf32>
    %32 = vector.broadcast %28 : vector<1x128x1xf32> to vector<2x128x128xf32>
    %33 = vector.broadcast %31 : vector<2x1x128xf32> to vector<2x128x128xf32>
    %34 = arith.mulf %32, %33 : vector<2x128x128xf32>
    %35 = arith.addf %26, %34 : vector<2x128x128xf32>
    %cst = arith.constant 3.000000e+00 : f32
    %36 = vector.broadcast %cst : f32 to vector<2x128x128xf32>
    %37 = arith.addf %35, %36 : vector<2x128x128xf32>
    %cst_7 = arith.constant 0.000000e+00 : f32
    %cst_8 = arith.constant 6.000000e+00 : f32
    %38 = vector.broadcast %cst_7 : f32 to vector<2x128x128xf32>
    %39 = arith.maximumf %38, %37 : vector<2x128x128xf32>
    %40 = vector.broadcast %cst_8 : f32 to vector<2x128x128xf32>
    %41 = arith.minimumf %40, %39 : vector<2x128x128xf32>
    %42 = arith.mulf %35, %41 : vector<2x128x128xf32>
    %cst_9 = arith.constant 0.166666672 : f32
    %43 = vector.broadcast %cst_9 : f32 to vector<2x128x128xf32>
    %44 = arith.mulf %42, %43 : vector<2x128x128xf32>
    %c0_10 = arith.constant 0 : index
    %c0_11 = arith.constant 0 : index
    %45 = vector.load %arg6[%c0_10, %c0_11] : memref<2x128xf32, #tpu.memory_space<vmem>>, vector<2x128xf32>
    %cst_12 = arith.constant dense<0.000000e+00> : vector<2x128xf32>
    %46 = vector.multi_reduction <add>, %44, %cst_12 [2] : vector<2x128x128xf32> to vector<2x128xf32>
    %47 = arith.addf %45, %46 : vector<2x128xf32>
    %c0_13 = arith.constant 0 : index
    %c0_14 = arith.constant 0 : index
    %48 = vector.load %arg6[%c0_13, %c0_14] : memref<2x128xf32, #tpu.memory_space<vmem>>, vector<2x128xf32>
    tpu.vector_store %arg6[%c0_13, %c0_14], %47 {strides = array<i32>} : memref<2x128xf32, #tpu.memory_space<vmem>>, vector<2x128xf32>,
    %c1_i32 = arith.constant 1 : i32
    %49 = arith.cmpi eq, %arg1, %c1_i32 : i32
    %50 = arith.extui %49 : i1 to i32
    %c0_i32_15 = arith.constant 0 : i32
    %51 = arith.cmpi ne, %50, %c0_i32_15 : i32
    scf.if %51 {
      %c0_16 = arith.constant 0 : index
      %c0_17 = arith.constant 0 : index
      %52 = vector.load %arg6[%c0_16, %c0_17] : memref<2x128xf32, #tpu.memory_space<vmem>>, vector<2x128xf32>
      %cst_18 = arith.constant 3.906250e-03 : f32
      %53 = vector.broadcast %cst_18 : f32 to vector<2x128xf32>
      %54 = arith.mulf %52, %53 : vector<2x128xf32>
      %55 = arith.truncf %54 : vector<2x128xf32> to vector<2x128xbf16>
      %c0_19 = arith.constant 0 : index
      %c0_20 = arith.constant 0 : index
      %56 = vector.load %arg5[%c0_19, %c0_20] : memref<2x128xbf16, #tpu.memory_space<vmem>>, vector<2x128xbf16>
      tpu.vector_store %arg5[%c0_19, %c0_20], %55 {strides = array<i32>} : memref<2x128xbf16, #tpu.memory_space<vmem>>, vector<2x128xbf16>,
    } else {
    }
    return
  }
  func.func @transform_0(%arg0: i32, %arg1: i32) -> (i32, i32, i32) {
    %c0_i32 = arith.constant 0 : i32
    %c0_i32_0 = arith.constant 0 : i32
    return %arg0, %c0_i32, %arg1 : i32, i32, i32
  }
  func.func @transform_1(%arg0: i32, %arg1: i32) -> (i32, i32) {
    %c0_i32 = arith.constant 0 : i32
    %c0_i32_0 = arith.constant 0 : i32
    %c0_i32_1 = arith.constant 0 : i32
    return %c0_i32, %c0_i32_0 : i32, i32
  }
  func.func @transform_2(%arg0: i32, %arg1: i32) -> (i32, i32) {
    %c0_i32 = arith.constant 0 : i32
    %c0_i32_0 = arith.constant 0 : i32
    %c0_i32_1 = arith.constant 0 : i32
    return %c0_i32, %c0_i32_0 : i32, i32
  }
  func.func @transform_3(%arg0: i32, %arg1: i32) -> (i32, i32) {
    %c0_i32 = arith.constant 0 : i32
    %c0_i32_0 = arith.constant 0 : i32
    return %arg0, %c0_i32 : i32, i32
  }
}

</mosaic_0001>

<bundles_post_ra>
// kernel: tpu_custom_call.1
= control target key start
LH: loop header
LB: loop body
LE: loop exit
PB: predicated region body
PF: predicated region fallthrough
CT: control target
= control target key end

     0   :  { %8 = vsyncpa [#allocation5], 0  ;;  %s1353_s12 = smov 0   ;;  %s1355_s13 = smov 0   ;;  %s2014_s0 = inlined_call_operand.vmem [shape: f32[2,3,256], index: 0, kind: input, shape index: {}]   ;;  %s2015_s1 = inlined_call_operand.vmem [shape: f32[128,3], index: 1, kind: input, shape index: {}]   ;;  %s2016_s2 = inlined_call_operand.vmem [shape: f32[128,1], index: 2, kind: input, shape index: {}]   ;;  %s2017_s3 = inlined_call_operand.hbm [shape: bf16[2,128], index: 3, kind: output, shape index: {}]  }
   0x1   :  { %s1357_s14 = smov 0   ;;  %s1359_s15 = smov 0  }
   0x2   :  { %s1361_s16 = smov 0  }
   0x3 LB: > { %s1183_s17 = sadd.s32 4294967295, %s1326_s16   ;;  %s23_s18 = sadd.s32 1, %s1322_s15  ;;  %s1326_s16 = sphi %s1361_s16, %s14_s16   ;;  %s1322_s15 = sphi %s1359_s15, %s2023_s15   ;;  %s1318_s14 = sphi %s1357_s14, %s2022_s14   ;;  %s1314_s13 = sphi %s1355_s13, %s2021_s13   ;;  %s1310_s12 = sphi %s1353_s12, %s2020_s12  }
   0x4   : > { %p24_p0 = scmp.ge.s32.totalorder %s23_s18, 2  ;;  %p42_p1 = scmp.ne.s32.totalorder %s1314_s13, %s1310_s12 }
   0x5   : > { %p43_p2 = scmp.eq.s32.totalorder %s1326_s16, 0  ;;  %s35_s20 = sadd.s32 1, %s1314_s13 }
   0x6   : > { %s2025_s18 = smov (%p24_p0, %s23_s18), 0  ;;  %p1185_p5 = scmp.ge.s32.totalorder %s1326_s16, 2 }
   0x7   : > { %p44_p3 = por %p43_p2, %p42_p1  ;;  %s31_s19 = ssub.s32 %s1322_s15, %s2025_s18 }
   0x8   : > { %p33_p4 = scmp.eq.s32.totalorder %s31_s19, 0  ;;  %142 = sbr.rel (%p1185_p5) target bundleno = 19 (0x13), region = 24 }
   0xa   : > { %s1389_s21 = scalar_select %p33_p4, %s1314_s13, %s35_s20  }
   0xd   : > { %145 = sbr.rel (!%p44_p3) target bundleno = 19 (0x13), region = 28  ;;  %s147_s22 = sand.u32 (%p44_p3), 1, %s1314_s13  }
   0xe   : > { %s1187_s23 = sshll.u32 (%p44_p3), %s1322_s15, 2  ;;  %s1186_s24 = sshll.u32 (%p44_p3), %s147_s22, 3 }
   0xf   : > { %s154_s27 = scalar_lea.vmem (%p44_p3), %s2014_s0, %s1187_s23  ;;  %s149_s28 = scalar_lea.vmem (%p44_p3), [#allocation3], %s1186_s24 }
  0x10   : > { %v171_v0 = vld [vmem:[%s154_s27] sm:$0xf] (%p44_p3)  ;;  %v173_v1 = vld [vmem:[%s154_s27 + $0x8] sm:$0xf] (%p44_p3) }
  0x11   : > { %172 = vst [vmem:[%s149_s28] sm:$0xf] (%p44_p3), %v171_v0 }
  0x12   : > { %174 = vst [vmem:[%s149_s28 + $0x4] sm:$0xf] %v173_v1 }
  0x13 PF: > { %p1188_p6 = scmp.ge.s32.totalorder %s1326_s16, 1  ;;  %p201_p7 = scmp.lt.s32.totalorder %s1326_s16, 3 }
  0x15   : > { %p202_p8 = pnand %p1188_p6, %p201_p7 }
  0x17   : > { %205 = sbr.rel (%p202_p8) target bundleno = 522 (0x20a), region = 69 }
  0x1c   : > { %s208_s29 = sand.u32 1, %s1310_s12   ;;  %p1190_p9 = scmp.ne.s32.totalorder %s1318_s14, 0 }
  0x1d   : > { %s1400_s30 = sshll.u32 %s208_s29, 3 }
  0x1e   : > { %s210_s4 = scalar_lea.vmem [#allocation3], %s1400_s30  ;;  %230 = sbr.rel (%p1190_p9) target bundleno = 37 (0x25), region = 77 }
  0x23   : > { %v1328_v2 = vmov 0.0  }
  0x24   : > { %231 = vst [vmem:[#allocation2] sm:$0x3] %v1328_v2 }
  0x25 PF: > { %v254_v3 = vld [vmem:[%s2016_s2 + $0x20] sm:$0xff]  ;;  %v252_v4 = vld [vmem:[%s2016_s2 + $0x10] sm:$0xff]  ;;  %v1329_v6 = vmov 0   ;;  %v255_v7 = vld [vmem:[%s2016_s2 + $0x28] sm:$0xff]  ;;  %v1330_v36 = vmov 1   ;;  %v1331_v50 = vmov 2  }
  0x26   : > { %v250_v5 = vld [vmem:[%s2016_s2] sm:$0xff]  ;;  %1249 = vset.pattern.permute.xlu2 %v1329_v6  ;;  %1248 = vset.pattern.permute.xlu1 %v1329_v6  ;;  %v253_v8 = vld [vmem:[%s2016_s2 + $0x18] sm:$0xff]  ;;  %v251_v9 = vld [vmem:[%s2016_s2 + $0x8] sm:$0xff]  ;;  %vm1014_vm0 = vcmask 130112   ;;  %vm1018_vm1 = vcmask 195712   ;;  %vm1022_vm2 = vcmask 261312  }
  0x27   : > { %1247 = vset.pattern.permute.xlu0 %v1329_v6  ;;  %288 = vperm.xlu2 %1249, %v254_v3   ;;  %v258_v10 = vld [vmem:[%s2016_s2 + $0x40] sm:$0xff]  ;;  %v257_v11 = vld [vmem:[%s2016_s2 + $0x38] sm:$0xff]  ;;  %v256_v12 = vld [vmem:[%s2016_s2 + $0x30] sm:$0xff]  ;;  %vm1026_vm3 = vcmask 326912   ;;  %vm1030_vm4 = vcmask 392512   ;;  %vm1034_vm5 = vcmask 458112  }
  0x28   : > { %278 = vperm.xlu1 %1248, %v252_v4   ;;  %268 = vperm.xlu0 %1247, %v250_v5   ;;  %v261_v13 = vld [vmem:[%s2016_s2 + $0x58] sm:$0xff]  ;;  %v260_v14 = vld [vmem:[%s2016_s2 + $0x50] sm:$0xff]  ;;  %v259_v15 = vld [vmem:[%s2016_s2 + $0x48] sm:$0xff]  ;;  %vm1038_vm6 = vcmask 523712   ;;  %vm1042_vm7 = vcmask 589312   ;;  %vm1046_vm8 = vcmask 654912  }
  0x29   : > { %v264_v16 = vld [vmem:[%s2016_s2 + $0x70] sm:$0xff]  ;;  %v263_v17 = vld [vmem:[%s2016_s2 + $0x68] sm:$0xff]  ;;  %v262_v18 = vld [vmem:[%s2016_s2 + $0x60] sm:$0xff]  ;;  %vm1050_vm9 = vcmask 720512   ;;  %vm1054_vm10 = vcmask 786112   ;;  %vm1058_vm11 = vcmask 851712  }
  0x2a   : > { %v1452_v19 = vld [vmem:[%s2015_s1 + $0x8] sm:$0xff]  ;;  %v265_v20 = vld [vmem:[%s2016_s2 + $0x78] sm:$0xff]  ;;  %v1460_v21 = vld [vmem:[%s2015_s1] sm:$0xff]  ;;  %vm1062_vm12 = vcmask 917312   ;;  %vm1066_vm13 = vcmask 982912   ;;  %vm1070_vm14 = vcmask 1048512  }
  0x2b   : > { %v1467_v22 = vld [vmem:[%s2015_s1 + $0x20] sm:$0xff]  ;;  %v1472_v23 = vld [vmem:[%s2015_s1 + $0x10] sm:$0xff]  ;;  %v1477_v24 = vld [vmem:[%s2015_s1 + $0x18] sm:$0xff]  ;;  %vm1103_vm15 = vcmask 1041409   ;;  %p1191_p10 = scmp.ne.s32.totalorder %s1318_s14, 1 }
  0x2c   : > { %v1485_v25 = vld [vmem:[%s2015_s1 + $0x38] sm:$0xff]  ;;  %v1490_v26 = vld [vmem:[%s2015_s1 + $0x28] sm:$0xff]  ;;  %v1495_v27 = vld [vmem:[%s2015_s1 + $0x30] sm:$0xff] }
  0x2d   : > { %v1503_v28 = vld [vmem:[%s2015_s1 + $0x50] sm:$0xff]  ;;  %v1508_v29 = vld [vmem:[%s2015_s1 + $0x40] sm:$0xff]  ;;  %v1513_v30 = vld [vmem:[%s2015_s1 + $0x48] sm:$0xff] }
  0x2e   : > { %v1521_v31 = vld [vmem:[%s2015_s1 + $0x68] sm:$0xff]  ;;  %v1526_v32 = vld [vmem:[%s2015_s1 + $0x58] sm:$0xff]  ;;  %v1531_v33 = vld [vmem:[%s2015_s1 + $0x60] sm:$0xff] }
  0x2f   : > { %293 = vperm.xlu2 %1249, %v255_v7   ;;  %v1539_v34 = vld [vmem:[%s2015_s1 + $0x70] sm:$0xff]  ;;  %v1544_v35 = vld [vmem:[%s2015_s1 + $0x78] sm:$0xff]  ;;  %v1578_v46 = vld [vmem:[%s210_s4] sm:$0x7] }
  0x30   : > { %283 = vperm.xlu1 %1248, %v253_v8   ;;  %273 = vperm.xlu0 %1247, %v251_v9   ;;  %v1582_v47 = vld [vmem:[%s210_s4 + $0x4] sm:$0x7]  ;;  %v1585_v48 = vperm.slane %v1578_v46, 0 }
  0x31   : > { %v1588_v49 = vperm.slane %v1582_v47, 0 }
  0x37   : > { %308 = vperm.xlu2 %1249, %v258_v10  }
  0x38   : > { %303 = vperm.xlu1 %1248, %v257_v11   ;;  %298 = vperm.xlu0 %1247, %v256_v12  }
  0x3f   : > { %323 = vperm.xlu2 %1249, %v261_v13  }
  0x40   : > { %318 = vperm.xlu1 %1248, %v260_v14   ;;  %313 = vperm.xlu0 %1247, %v259_v15  }
  0x47   : > { %338 = vperm.xlu2 %1249, %v264_v16  }
  0x48   : > { %333 = vperm.xlu1 %1248, %v263_v17   ;;  %328 = vperm.xlu0 %1247, %v262_v18  }
  0x4f   : > { %353 = vperm.xlu2 %1249, %v1452_v19  }
  0x50   : > { %343 = vperm.xlu0 %1247, %v265_v20   ;;  %348 = vperm.xlu1 %1248, %v1460_v21  }
  0x57   : > { %368 = vperm.xlu2 %1249, %v1467_v22  }
  0x58   : > { %358 = vperm.xlu0 %1247, %v1472_v23   ;;  %363 = vperm.xlu1 %1248, %v1477_v24  }
  0x5f   : > { %383 = vperm.xlu2 %1249, %v1485_v25  }
  0x60   : > { %373 = vperm.xlu0 %1247, %v1490_v26   ;;  %378 = vperm.xlu1 %1248, %v1495_v27  }
  0x67   : > { %398 = vperm.xlu2 %1249, %v1503_v28  }
  0x68   : > { %388 = vperm.xlu0 %1247, %v1508_v29   ;;  %393 = vperm.xlu1 %1248, %v1513_v30  }
  0x6f   : > { %413 = vperm.xlu2 %1249, %v1521_v31  }
  0x70   : > { %403 = vperm.xlu0 %1247, %v1526_v32   ;;  %408 = vperm.xlu1 %1248, %v1531_v33  }
  0x77   : > { %1250 = vset.pattern.permute.xlu2 %v1330_v36 }
  0x78   : > { %418 = vperm.xlu0 %1247, %v1539_v34   ;;  %423 = vperm.xlu1 %1248, %v1544_v35  }
  0x79   : > { %493 = vperm.xlu2 %1250, %v1460_v21  }
  0x80   : > { %1251 = vset.pattern.permute.xlu0 %v1330_v36  ;;  %1252 = vset.pattern.permute.xlu1 %v1330_v36 }
  0x81   : > { %497 = vperm.xlu0 %1251, %v1452_v19   ;;  %505 = vperm.xlu2 %1250, %v1477_v24   ;;  %v289_v37 = vpop.permute.xlu2 %288 }
  0x82   : > { %501 = vperm.xlu1 %1252, %v1472_v23  }
  0x89   : > { %517 = vperm.xlu0 %1251, %v1495_v27   ;;  %513 = vperm.xlu2 %1250, %v1490_v26   ;;  %v1554_v38 = vpop.permute.xlu2 %293 }
  0x8a   : > { %509 = vperm.xlu1 %1252, %v1467_v22  }
  0x91   : > { %529 = vperm.xlu0 %1251, %v1513_v30   ;;  %525 = vperm.xlu2 %1250, %v1508_v29   ;;  %v1559_v39 = vpop.permute.xlu2 %308 }
  0x92   : > { %521 = vperm.xlu1 %1252, %v1485_v25  }
  0x99   : > { %541 = vperm.xlu0 %1251, %v1531_v33   ;;  %537 = vperm.xlu2 %1250, %v1526_v32   ;;  %v1564_v40 = vpop.permute.xlu2 %323 }
  0x9a   : > { %533 = vperm.xlu1 %1252, %v1503_v28   ;;  %v1567_v41 = vpop.permute.xlu1 %278  ;;  %v269_v42 = vpop.permute.xlu0 %268 }
  0xa1   : > { %553 = vperm.xlu0 %1251, %v1544_v35   ;;  %549 = vperm.xlu2 %1250, %v1539_v34   ;;  %v1571_v43 = vpop.permute.xlu2 %338 }
  0xa2   : > { %545 = vperm.xlu1 %1252, %v1521_v31   ;;  %v1574_v44 = vpop.permute.xlu1 %283  ;;  %v274_v45 = vpop.permute.xlu0 %273 }
  0xa9   : > { %1255 = vset.pattern.permute.xlu0 %v1331_v50  ;;  %1254 = vset.pattern.permute.xlu2 %v1331_v50  ;;  %v354_v51 = vpop.permute.xlu2 %353 }
  0xaa   : > { %1253 = vset.pattern.permute.xlu1 %v1331_v50  ;;  %v304_v52 = vpop.permute.xlu1 %303  ;;  %v1590_v53 = vpop.permute.xlu0 %298  ;;  %631 = vperm.xlu0 %1255, %v1472_v23   ;;  %v429_v54 = vmul.f32 %v1585_v48, %v354_v51  ;;  %v445_v55 = vmul.f32 %v1588_v49, %v354_v51 }
  0xab   : > { %627 = vperm.xlu2 %1254, %v1452_v19   ;;  %623 = vperm.xlu1 %1253, %v1460_v21  }
  0xac   : > { %v1597_v56 = vadd.f32 %v429_v54, %v274_v45  ;;  %v1599_v57 = vadd.f32 %v445_v55, %v274_v45 }
  0xb1   : > { %v369_v58 = vpop.permute.xlu2 %368 }
  0xb2   : > { %v319_v59 = vpop.permute.xlu1 %318  ;;  %v1601_v60 = vpop.permute.xlu0 %313  ;;  %651 = vperm.xlu0 %1255, %v1485_v25   ;;  %v432_v61 = vmul.f32 %v1585_v48, %v369_v58  ;;  %v448_v62 = vmul.f32 %v1588_v49, %v369_v58 }
  0xb3   : > { %639 = vperm.xlu2 %1254, %v1467_v22   ;;  %635 = vperm.xlu1 %1253, %v1477_v24  }
  0xb4   : > { %v1608_v63 = vadd.f32 %v432_v61, %v289_v37  ;;  %v1610_v0 = vadd.f32 %v448_v62, %v289_v37  ;;  %v1660_v37 = vperm.slane %v1582_v47, 1 }
  0xb9   : > { %v384_v1 = vpop.permute.xlu2 %383 }
  0xba   : > { %v334_v2 = vpop.permute.xlu1 %333  ;;  %v1612_v3 = vpop.permute.xlu0 %328  ;;  %663 = vperm.xlu0 %1255, %v1503_v28   ;;  %v435_v4 = vmul.f32 %v1585_v48, %v384_v1  ;;  %v451_v5 = vmul.f32 %v1588_v49, %v384_v1 }
  0xbb   : > { %647 = vperm.xlu2 %1254, %v1495_v27   ;;  %643 = vperm.xlu1 %1253, %v1490_v26  }
  0xbc   : > { %v1619_v6 = vadd.f32 %v435_v4, %v304_v52  ;;  %v1621_v7 = vadd.f32 %v451_v5, %v304_v52 }
  0xc1   : > { %v399_v8 = vpop.permute.xlu2 %398 }
  0xc2   : > { %v1623_v9 = vpop.permute.xlu0 %343  ;;  %675 = vperm.xlu0 %1255, %v1521_v31   ;;  %v438_v10 = vmul.f32 %v1585_v48, %v399_v8  ;;  %v454_v11 = vmul.f32 %v1588_v49, %v399_v8  ;;  %v349_v12 = vpop.permute.xlu1 %348 }
  0xc3   : > { %659 = vperm.xlu2 %1254, %v1513_v30   ;;  %655 = vperm.xlu1 %1253, %v1508_v29   ;;  %v428_v13 = vmul.f32 %v1585_v48, %v349_v12  ;;  %v444_v14 = vmul.f32 %v1588_v49, %v349_v12 }
  0xc4   : > { %v1632_v15 = vadd.f32 %v438_v10, %v319_v59  ;;  %v1634_v16 = vadd.f32 %v454_v11, %v319_v59 }
  0xc5   : > { %v460_v17 = vadd.f32 %v428_v13, %v269_v42  ;;  %v476_v18 = vadd.f32 %v444_v14, %v269_v42 }
  0xc9   : > { %v414_v19 = vpop.permute.xlu2 %413 }
  0xca   : > { %v359_v20 = vpop.permute.xlu0 %358  ;;  %v441_v21 = vmul.f32 %v1585_v48, %v414_v19  ;;  %v457_v22 = vmul.f32 %v1588_v49, %v414_v19  ;;  %v364_v23 = vpop.permute.xlu1 %363 }
  0xcb   : > { %v430_v24 = vmul.f32 %v1585_v48, %v359_v20  ;;  %v446_v25 = vmul.f32 %v1588_v49, %v359_v20  ;;  %671 = vperm.xlu2 %1254, %v1531_v33   ;;  %667 = vperm.xlu1 %1253, %v1526_v32   ;;  %v431_v26 = vmul.f32 %v1585_v48, %v364_v23  ;;  %v1657_v32 = vperm.slane %v1578_v46, 1 }
  0xcc   : > { %v1643_v27 = vadd.f32 %v441_v21, %v334_v2  ;;  %v1645_v28 = vadd.f32 %v457_v22, %v334_v2  ;;  %v447_v29 = vmul.f32 %v1588_v49, %v364_v23 }
  0xcd   : > { %v1649_v30 = vadd.f32 %v430_v24, %v1567_v41  ;;  %v1652_v31 = vadd.f32 %v446_v25, %v1567_v41  ;;  %v463_v36 = vadd.f32 %v431_v26, %v1574_v44 }
  0xce   : > { %v479_v33 = vadd.f32 %v447_v29, %v1574_v44 }
  0xd2   : > { %v374_v42 = vpop.permute.xlu0 %373  ;;  %v379_v45 = vpop.permute.xlu1 %378 }
  0xd3   : > { %683 = vperm.xlu2 %1254, %v1544_v35   ;;  %679 = vperm.xlu1 %1253, %v1539_v34   ;;  %v434_v50 = vmul.f32 %v1585_v48, %v379_v45  ;;  %v494_v41 = vpop.permute.xlu2 %493  ;;  %v450_v51 = vmul.f32 %v1588_v49, %v379_v45  ;;  %v433_v11 = vmul.f32 %v1585_v48, %v374_v42 }
  0xd4   : > { %v558_v52 = vmul.f32 %v1657_v32, %v494_v41  ;;  %v574_v44 = vmul.f32 %v1660_v37, %v494_v41  ;;  %v449_v12 = vmul.f32 %v1588_v49, %v374_v42 }
  0xd5   : > { %v1669_v54 = vadd.f32 %v434_v50, %v1590_v53  ;;  %v1672_v55 = vadd.f32 %v450_v51, %v1590_v53  ;;  %v465_v20 = vadd.f32 %v433_v11, %v1554_v38 }
  0xd6   : > { %v1674_v58 = vadd.f32 %v558_v52, %v460_v17  ;;  %v1676_v35 = vadd.f32 %v574_v44, %v476_v18 }
  0xda   : > { %v389_v34 = vpop.permute.xlu0 %388  ;;  %v394_v59 = vpop.permute.xlu1 %393 }
  0xdb   : > { %v437_v61 = vmul.f32 %v1585_v48, %v394_v59  ;;  %v453_v62 = vmul.f32 %v1588_v49, %v394_v59  ;;  %v506_v1 = vpop.permute.xlu2 %505  ;;  %v436_v29 = vmul.f32 %v1585_v48, %v389_v34 }
  0xdc   : > { %v561_v2 = vmul.f32 %v1657_v32, %v506_v1  ;;  %v577_v4 = vmul.f32 %v1660_v37, %v506_v1 }
  0xdd   : > { %v1683_v5 = vadd.f32 %v437_v61, %v1601_v60  ;;  %v1686_v53 = vadd.f32 %v453_v62, %v1601_v60  ;;  %v481_v60 = vadd.f32 %v449_v12, %v1554_v38  ;;  %v468_v41 = vadd.f32 %v436_v29, %v1559_v39 }
  0xde   : > { %v1688_v8 = vadd.f32 %v561_v2, %v463_v36  ;;  %v1690_v10 = vadd.f32 %v577_v4, %v479_v33  ;;  %v452_v36 = vmul.f32 %v1588_v49, %v389_v34 }
  0xe2   : > { %v404_v13 = vpop.permute.xlu0 %403  ;;  %v409_v14 = vpop.permute.xlu1 %408 }
  0xe3   : > { %v440_v17 = vmul.f32 %v1585_v48, %v409_v14  ;;  %v456_v18 = vmul.f32 %v1588_v49, %v409_v14  ;;  %v514_v19 = vpop.permute.xlu2 %513  ;;  %v439_v62 = vmul.f32 %v1585_v48, %v404_v13  ;;  %v455_v1 = vmul.f32 %v1588_v49, %v404_v13 }
  0xe4   : > { %v563_v21 = vmul.f32 %v1657_v32, %v514_v19  ;;  %v579_v22 = vmul.f32 %v1660_v37, %v514_v19 }
  0xe5   : > { %v1701_v23 = vadd.f32 %v440_v17, %v1612_v3  ;;  %v1704_v24 = vadd.f32 %v456_v18, %v1612_v3  ;;  %v484_v3 = vadd.f32 %v452_v36, %v1559_v39  ;;  %v471_v39 = vadd.f32 %v439_v62, %v1564_v40 }
  0xe6   : > { %v1706_v25 = vadd.f32 %v563_v21, %v465_v20  ;;  %v1708_v26 = vadd.f32 %v579_v22, %v481_v60  ;;  %v487_v11 = vadd.f32 %v455_v1, %v1564_v40 }
  0xea   : > { %v419_v33 = vpop.permute.xlu0 %418  ;;  %v424_v38 = vpop.permute.xlu1 %423 }
  0xeb   : > { %v443_v42 = vmul.f32 %v1585_v48, %v424_v38  ;;  %v459_v45 = vmul.f32 %v1588_v49, %v424_v38  ;;  %v526_v50 = vpop.permute.xlu2 %525  ;;  %v442_v60 = vmul.f32 %v1585_v48, %v419_v33  ;;  %v458_v21 = vmul.f32 %v1588_v49, %v419_v33 }
  0xec   : > { %v566_v51 = vmul.f32 %v1657_v32, %v526_v50  ;;  %v582_v52 = vmul.f32 %v1660_v37, %v526_v50 }
  0xed   : > { %v1719_v44 = vadd.f32 %v443_v42, %v1623_v9  ;;  %v1722_v34 = vadd.f32 %v459_v45, %v1623_v9  ;;  %v474_v22 = vadd.f32 %v442_v60, %v1571_v43  ;;  %v490_v38 = vadd.f32 %v458_v21, %v1571_v43 }
  0xee   : > { %v1724_v59 = vadd.f32 %v566_v51, %v468_v41  ;;  %v1726_v61 = vadd.f32 %v582_v52, %v484_v3  ;;  %v1766_v3 = vperm.slane %v1578_v46, 2 }
  0xf3   : > { %v498_v2 = vpop.permute.xlu0 %497  ;;  %v538_v4 = vpop.permute.xlu2 %537 }
  0xf4   : > { %v575_v12 = vmul.f32 %v1660_v37, %v498_v2  ;;  %v569_v14 = vmul.f32 %v1657_v32, %v538_v4  ;;  %v585_v9 = vmul.f32 %v1660_v37, %v538_v4  ;;  %v502_v17 = vpop.permute.xlu1 %501  ;;  %v559_v43 = vmul.f32 %v1657_v32, %v498_v2 }
  0xf5   : > { %v576_v18 = vmul.f32 %v1660_v37, %v502_v17 }
  0xf6   : > { %v1737_v19 = vadd.f32 %v575_v12, %v1599_v57  ;;  %v1739_v20 = vadd.f32 %v569_v14, %v471_v39  ;;  %v1741_v13 = vadd.f32 %v585_v9, %v487_v11  ;;  %v591_v39 = vadd.f32 %v559_v43, %v1597_v56 }
  0xf7   : > { %v1745_v40 = vadd.f32 %v576_v18, %v1652_v31 }
  0xfb   : > { %v518_v29 = vpop.permute.xlu0 %517  ;;  %v550_v36 = vpop.permute.xlu2 %549 }
  0xfc   : > { %v580_v57 = vmul.f32 %v1660_v37, %v518_v29  ;;  %v572_v42 = vmul.f32 %v1657_v32, %v550_v36  ;;  %v588_v45 = vmul.f32 %v1660_v37, %v550_v36  ;;  %v510_v50 = vpop.permute.xlu1 %509 }
  0xfd   : > { %v578_v48 = vmul.f32 %v1660_v37, %v510_v50 }
  0xfe   : > { %v1755_v31 = vadd.f32 %v580_v57, %v1672_v55  ;;  %v1757_v41 = vadd.f32 %v572_v42, %v474_v22  ;;  %v1759_v49 = vadd.f32 %v588_v45, %v490_v38 }
  0xff   : > { %v1762_v33 = vadd.f32 %v578_v48, %v1610_v0 }
 0x103   : > { %v1768_v51 = vpop.permute.xlu0 %529 }
 0x104   : > { %v583_v52 = vmul.f32 %v1660_v37, %v1768_v51  ;;  %v522_v62 = vpop.permute.xlu1 %521 }
 0x105   : > { %v581_v55 = vmul.f32 %v1660_v37, %v522_v62  ;;  %v1773_v1 = vpop.permute.xlu2 %627 }
 0x106   : > { %v1777_v0 = vadd.f32 %v583_v52, %v1686_v53  ;;  %v689_v2 = vmul.f32 %v1766_v3, %v1773_v1 }
 0x107   : > { %v1782_v46 = vadd.f32 %v581_v55, %v1621_v7 }
 0x108   : > { %v721_v4 = vadd.f32 %v689_v2, %v591_v39 }
 0x10a   : > { %v753_v11 = vadd.f32 3.0, %v721_v4 }
 0x10b   : > { %v542_v12 = vpop.permute.xlu0 %541 }
 0x10c   : > { %v570_v14 = vmul.f32 %v1657_v32, %v542_v12  ;;  %v586_v9 = vmul.f32 %v1660_v37, %v542_v12  ;;  %v534_v18 = vpop.permute.xlu1 %533  ;;  %v785_v60 = vmax.f32 %v753_v11, 0.0  ;;  %v560_v11 = vmul.f32 %v1657_v32, %v502_v17 }
 0x10d   : > { %v584_v56 = vmul.f32 %v1660_v37, %v534_v18  ;;  %v1787_v21 = vpop.permute.xlu2 %639  ;;  %v564_v17 = vmul.f32 %v1657_v32, %v518_v29 }
 0x10e   : > { %v602_v53 = vadd.f32 %v570_v14, %v1701_v23  ;;  %v1791_v22 = vadd.f32 %v586_v9, %v1704_v24  ;;  %v817_v36 = vmin.f32 %v785_v60, 6.0 }
 0x10f   : > { %v1794_v7 = vadd.f32 %v584_v56, %v1634_v16 }
 0x110   : > { %v849_v38 = vmul.f32 %v817_v36, %v721_v4  ;;  %v562_v4 = vmul.f32 %v1657_v32, %v510_v50 }
 0x112   : > { %v881_v42 = vmul.f32 0.16666667, %v849_v38  ;;  %v594_v12 = vadd.f32 %v562_v4, %v1608_v63  ;;  %v565_v63 = vmul.f32 %v1657_v32, %v522_v62 }
 0x113   : > { %v554_v57 = vpop.permute.xlu0 %553 }
 0x114   : > { %v573_v45 = vmul.f32 %v1657_v32, %v554_v57  ;;  %v589_v48 = vmul.f32 %v1660_v37, %v554_v57  ;;  %v546_v43 = vpop.permute.xlu1 %545  ;;  %915 = vadd.xlane.f32.xlu1 %v881_v42 }
 0x115   : > { %v571_v52 = vmul.f32 %v1657_v32, %v546_v43  ;;  %v587_v55 = vmul.f32 %v1660_v37, %v546_v43  ;;  %v1800_v23 = vpop.permute.xlu2 %647  ;;  %v692_v37 = vmul.f32 %v1766_v3, %v1787_v21 }
 0x116   : > { %v1803_v24 = vadd.f32 %v573_v45, %v1719_v44  ;;  %v1806_v16 = vadd.f32 %v589_v48, %v1722_v34  ;;  %v592_v34 = vadd.f32 %v560_v11, %v1649_v30  ;;  %v694_v30 = vmul.f32 %v1766_v3, %v1800_v23 }
 0x117   : > { %v1809_v39 = vadd.f32 %v571_v52, %v1643_v27  ;;  %v1812_v2 = vadd.f32 %v587_v55, %v1645_v28  ;;  %v724_v9 = vadd.f32 %v692_v37, %v594_v12  ;;  %v596_v45 = vadd.f32 %v564_v17, %v1669_v54 }
 0x118   : > { %2018 = vst [vmem:[#allocation7_spill] sm:$0xff] %v1806_v16  ;;  %v597_v52 = vadd.f32 %v565_v63, %v1619_v6  ;;  %v567_v17 = vmul.f32 %v1657_v32, %v1768_v51  ;;  %v568_v63 = vmul.f32 %v1657_v32, %v534_v18  ;;  %v1858_v51 = vperm.slane %v1582_v47, 2 }
 0x119   : > { %v756_v57 = vadd.f32 3.0, %v724_v9  ;;  %v726_v4 = vadd.f32 %v694_v30, %v596_v45 }
 0x11a   : > { %v600_v32 = vadd.f32 %v568_v63, %v1632_v15  ;;  %v705_v63 = vmul.f32 %v1858_v51, %v1773_v1 }
 0x11b   : > { %v788_v37 = vmax.f32 %v756_v57, 0.0  ;;  %v758_v45 = vadd.f32 3.0, %v726_v4 }
 0x11c   : > { %v1819_v44 = vpop.permute.xlu0 %631 }
 0x11d   : > { %v690_v27 = vmul.f32 %v1766_v3, %v1819_v44  ;;  %v1824_v14 = vpop.permute.xlu2 %659  ;;  %v624_v28 = vpop.permute.xlu1 %623 }
 0x11e   : > { %v688_v50 = vmul.f32 %v1766_v3, %v624_v28  ;;  %v697_v57 = vmul.f32 %v1766_v3, %v1824_v14 }
 0x11f   : > { %v722_v60 = vadd.f32 %v690_v27, %v592_v34 }
 0x120   : > { %v720_v56 = vadd.f32 %v688_v50, %v1674_v58 }
 0x121   : > { %v754_v36 = vadd.f32 3.0, %v722_v60 }
 0x122   : > { %v752_v38 = vadd.f32 3.0, %v720_v56 }
 0x123   : > { %v786_v42 = vmax.f32 %v754_v36, 0.0 }
 0x124   : > { %v1833_v48 = vpop.permute.xlu0 %651  ;;  %v784_v43 = vmax.f32 %v752_v38, 0.0 }
 0x125   : > { %v695_v29 = vmul.f32 %v1766_v3, %v1833_v48  ;;  %v1838_v58 = vpop.permute.xlu2 %671  ;;  %v1840_v62 = vpop.permute.xlu1 %635  ;;  %v818_v55 = vmin.f32 %v786_v42, 6.0  ;;  %v820_v42 = vmin.f32 %v788_v37, 6.0 }
 0x126   : > { %v700_v11 = vmul.f32 %v1766_v3, %v1838_v58  ;;  %v691_v54 = vmul.f32 %v1766_v3, %v1840_v62  ;;  %v816_v27 = vmin.f32 %v784_v43, 6.0 }
 0x127   : > { %v727_v12 = vadd.f32 %v695_v29, %v597_v52  ;;  %v850_v34 = vmul.f32 %v818_v55, %v722_v60 }
 0x128   : > { %v1846_v6 = vadd.f32 %v700_v11, %v602_v53  ;;  %v723_v50 = vadd.f32 %v691_v54, %v1688_v8  ;;  %v848_v30 = vmul.f32 %v816_v27, %v720_v56  ;;  %v599_v8 = vadd.f32 %v567_v17, %v1683_v5 }
 0x129   : > { %v882_v36 = vmul.f32 0.16666667, %v850_v34  ;;  %v759_v43 = vadd.f32 3.0, %v727_v12  ;;  %v852_v5 = vmul.f32 %v820_v42, %v724_v9  ;;  %v790_v54 = vmax.f32 %v758_v45, 0.0 }
 0x12a   : > { %v755_v38 = vadd.f32 3.0, %v723_v50  ;;  %v880_v60 = vmul.f32 0.16666667, %v848_v30  ;;  %v729_v47 = vadd.f32 %v697_v57, %v599_v8  ;;  %v704_v30 = vmul.f32 %v1858_v51, %v624_v28 }
 0x12b   : > { %917 = vadd.xlane.f32.xlu2 %v882_v36  ;;  %v791_v15 = vmax.f32 %v759_v43, 0.0 }
 0x12c   : > { %v1854_v53 = vpop.permute.xlu0 %663  ;;  %v787_v52 = vmax.f32 %v755_v38, 0.0  ;;  %913 = vadd.xlane.f32.xlu0 %v880_v60  ;;  %v884_v38 = vmul.f32 0.16666667, %v852_v5  ;;  %v822_v60 = vmin.f32 %v790_v54, 6.0  ;;  %v761_v45 = vadd.f32 3.0, %v729_v47 }
 0x12d   : > { %v698_v18 = vmul.f32 %v1766_v3, %v1854_v53  ;;  %v1863_v56 = vpop.permute.xlu2 %683  ;;  %v1865_v29 = vpop.permute.xlu1 %643  ;;  %v823_v42 = vmin.f32 %v791_v15, 6.0  ;;  %v736_v28 = vadd.f32 %v704_v30, %v1676_v35  ;;  %v708_v54 = vmul.f32 %v1858_v51, %v1787_v21 }
 0x12e   : > { %v703_v55 = vmul.f32 %v1766_v3, %v1863_v56  ;;  %v693_v11 = vmul.f32 %v1766_v3, %v1865_v29  ;;  %v819_v34 = vmin.f32 %v787_v52, 6.0  ;;  %v854_v8 = vmul.f32 %v822_v60, %v726_v4 }
 0x12f   : > { %v730_v37 = vadd.f32 %v698_v18, %v600_v32  ;;  %v706_v35 = vmul.f32 %v1858_v51, %v1819_v44 }
 0x130   : > { %v1872_v27 = vadd.f32 %v703_v55, %v1803_v24  ;;  %v725_v17 = vadd.f32 %v693_v11, %v1706_v25  ;;  %v851_v36 = vmul.f32 %v819_v34, %v723_v50  ;;  %v737_v24 = vadd.f32 %v705_v63, %v1737_v19 }
 0x131   : > { %v762_v57 = vadd.f32 3.0, %v730_v37  ;;  %v793_v55 = vmax.f32 %v761_v45, 0.0  ;;  %v886_v15 = vmul.f32 0.16666667, %v854_v8  ;;  %v738_v21 = vadd.f32 %v706_v35, %v1745_v40 }
 0x132   : > { %v757_v16 = vadd.f32 3.0, %v725_v17  ;;  %v883_v9 = vmul.f32 0.16666667, %v851_v36  ;;  %v769_v34 = vadd.f32 3.0, %v737_v24  ;;  %v768_v36 = vadd.f32 3.0, %v736_v28 }
 0x133   : > { %v794_v19 = vmax.f32 %v762_v57, 0.0  ;;  %v825_v30 = vmin.f32 %v793_v55, 6.0  ;;  %v710_v40 = vmul.f32 %v1858_v51, %v1800_v23  ;;  %v770_v8 = vadd.f32 3.0, %v738_v21 }
 0x134   : > { %v1878_v52 = vpop.permute.xlu0 %675  ;;  %v789_v43 = vmax.f32 %v757_v16, 0.0  ;;  %919 = vadd.xlane.f32.xlu2 %v883_v9  ;;  %921 = vadd.xlane.f32.xlu0 %v884_v38  ;;  %v855_v16 = vmul.f32 %v823_v42, %v727_v12  ;;  %v801_v60 = vmax.f32 %v769_v34, 0.0  ;;  %v709_v55 = vmul.f32 %v1858_v51, %v1865_v29 }
 0x135   : > { %v701_v25 = vmul.f32 %v1766_v3, %v1878_v52  ;;  %v1883_v1 = vpop.permute.xlu1 %655  ;;  %v826_v38 = vmin.f32 %v794_v19, 6.0  ;;  %v857_v45 = vmul.f32 %v825_v30, %v729_v47  ;;  %v713_v30 = vmul.f32 %v1858_v51, %v1824_v14 }
 0x136   : > { %v696_v50 = vmul.f32 %v1766_v3, %v1883_v1  ;;  %v821_v32 = vmin.f32 %v789_v43, 6.0  ;;  %v887_v12 = vmul.f32 0.16666667, %v855_v16  ;;  %v800_v43 = vmax.f32 %v768_v36, 0.0 }
 0x137   : > { %v1889_v18 = vadd.f32 %v701_v25, %v1809_v39  ;;  %v707_v39 = vmul.f32 %v1858_v51, %v1840_v62  ;;  %v858_v57 = vmul.f32 %v826_v38, %v730_v37  ;;  %v711_v16 = vmul.f32 %v1858_v51, %v1833_v48 }
 0x138   : > { %v728_v11 = vadd.f32 %v696_v50, %v1724_v59  ;;  %v853_v5 = vmul.f32 %v821_v32, %v725_v17  ;;  %v740_v17 = vadd.f32 %v708_v54, %v1762_v33  ;;  %v833_v33 = vmin.f32 %v801_v60, 6.0 }
 0x139   : > { %v739_v62 = vadd.f32 %v707_v39, %v1690_v10  ;;  %v889_v47 = vmul.f32 0.16666667, %v857_v45  ;;  %v890_v37 = vmul.f32 0.16666667, %v858_v57  ;;  %v741_v48 = vadd.f32 %v709_v55, %v1708_v26 }
 0x13a   : > { %v885_v63 = vmul.f32 0.16666667, %v853_v5  ;;  %v760_v4 = vadd.f32 3.0, %v728_v11  ;;  %v772_v32 = vadd.f32 3.0, %v740_v17  ;;  %v832_v5 = vmin.f32 %v800_v43, 6.0 }
 0x13b   : > { %v771_v54 = vadd.f32 3.0, %v739_v62  ;;  %v865_v35 = vmul.f32 %v833_v33, %v737_v24  ;;  %v712_v26 = vmul.f32 %v1858_v51, %v1883_v1  ;;  %v745_v45 = vadd.f32 %v713_v30, %v1777_v0 }
 0x13c   : > { %923 = vadd.xlane.f32.xlu1 %v885_v63  ;;  %v792_v59 = vmax.f32 %v760_v4, 0.0  ;;  %925 = vadd.xlane.f32.xlu2 %v886_v15  ;;  %v804_v34 = vmax.f32 %v772_v32, 0.0  ;;  %v802_v63 = vmax.f32 %v770_v8, 0.0  ;;  %v743_v4 = vadd.f32 %v711_v16, %v1782_v46 }
 0x13d   : > { %927 = vadd.xlane.f32.xlu0 %v887_v12  ;;  %v1900_v44 = vpop.permute.xlu1 %667  ;;  %v864_v36 = vmul.f32 %v832_v5, %v736_v28  ;;  %v803_v39 = vmax.f32 %v771_v54, 0.0  ;;  %v897_v24 = vmul.f32 0.16666667, %v865_v35  ;;  %v714_v46 = vmul.f32 %v1858_v51, %v1854_v53 }
 0x13e   : > { %v699_v9 = vmul.f32 %v1766_v3, %v1900_v44  ;;  %v824_v42 = vmin.f32 %v792_v59, 6.0  ;;  %v836_v38 = vmin.f32 %v804_v34, 6.0  ;;  %v834_v60 = vmin.f32 %v802_v63, 6.0 }
 0x13f   : > { %v896_v28 = vmul.f32 0.16666667, %v864_v36  ;;  %v744_v43 = vadd.f32 %v712_v26, %v1726_v61  ;;  %v777_v32 = vadd.f32 3.0, %v745_v45  ;;  %v715_v16 = vmul.f32 %v1858_v51, %v1900_v44 }
 0x140   : > { %v731_v25 = vadd.f32 %v699_v9, %v1739_v20  ;;  %v856_v50 = vmul.f32 %v824_v42, %v728_v11  ;;  %v742_v11 = vadd.f32 %v710_v40, %v1755_v31  ;;  %v773_v9 = vadd.f32 3.0, %v741_v48 }
 0x141   : > { %v835_v42 = vmin.f32 %v803_v39, 6.0  ;;  %v868_v14 = vmul.f32 %v836_v38, %v740_v17  ;;  %v716_v17 = vmul.f32 %v1858_v51, %v1838_v58  ;;  %v717_v35 = vmul.f32 %v1858_v51, %v1878_v52 }
 0x142   : > { %v888_v19 = vmul.f32 0.16666667, %v856_v50  ;;  %v763_v10 = vadd.f32 3.0, %v731_v25  ;;  %v774_v59 = vadd.f32 3.0, %v742_v11  ;;  %v805_v1 = vmax.f32 %v773_v9, 0.0 }
 0x143   : > { %v746_v50 = vadd.f32 %v714_v46, %v1794_v7  ;;  %v867_v40 = vmul.f32 %v835_v42, %v739_v62  ;;  %v900_v8 = vmul.f32 0.16666667, %v868_v14  ;;  %v809_v7 = vmax.f32 %v777_v32, 0.0 }
 0x144   : > { %929 = vadd.xlane.f32.xlu1 %v888_v19  ;;  %v795_v20 = vmax.f32 %v763_v10, 0.0  ;;  %931 = vadd.xlane.f32.xlu2 %v889_v47  ;;  %v806_v57 = vmax.f32 %v774_v59, 0.0  ;;  %v837_v0 = vmin.f32 %v805_v1, 6.0  ;;  %v776_v19 = vadd.f32 3.0, %v744_v43 }
 0x145   : > { %933 = vadd.xlane.f32.xlu0 %v890_v37  ;;  %v1913_v23 = vpop.permute.xlu1 %679  ;;  %v899_v10 = vmul.f32 0.16666667, %v867_v40  ;;  %v747_v62 = vadd.f32 %v715_v16, %v1741_v13  ;;  %v748_v44 = vadd.f32 %v716_v17, %v1791_v22  ;;  %v841_v58 = vmin.f32 %v809_v7, 6.0 }
 0x146   : > { %v702_v29 = vmul.f32 %v1766_v3, %v1913_v23  ;;  %v827_v15 = vmin.f32 %v795_v20, 6.0  ;;  %v838_v53 = vmin.f32 %v806_v57, 6.0  ;;  %v869_v37 = vmul.f32 %v837_v0, %v741_v48 }
 0x147   : > { %v808_v5 = vmax.f32 %v776_v19, 0.0  ;;  %v779_v63 = vadd.f32 3.0, %v747_v62  ;;  %v780_v13 = vadd.f32 3.0, %v748_v44  ;;  %v873_v22 = vmul.f32 %v841_v58, %v745_v45 }
 0x148   : > { %v1920_v12 = vadd.f32 %v702_v29, %v1757_v41  ;;  %v859_v31 = vmul.f32 %v827_v15, %v731_v25  ;;  %v775_v41 = vadd.f32 3.0, %v743_v4  ;;  %v866_v25 = vmul.f32 %v834_v60, %v738_v21 }
 0x149   : > { %v778_v21 = vadd.f32 3.0, %v746_v50  ;;  %v870_v47 = vmul.f32 %v838_v53, %v742_v11  ;;  %v901_v29 = vmul.f32 0.16666667, %v869_v37  ;;  %v840_v15 = vmin.f32 %v808_v5, 6.0 }
 0x14a   : > { %v891_v3 = vmul.f32 0.16666667, %v859_v31  ;;  %v807_v33 = vmax.f32 %v775_v41, 0.0  ;;  %v898_v55 = vmul.f32 0.16666667, %v866_v25  ;;  %v764_v31 = vadd.f32 3.0, %v1846_v6 }
 0x14b   : > { %v810_v20 = vmax.f32 %v778_v21, 0.0  ;;  %v902_v34 = vmul.f32 0.16666667, %v870_v47  ;;  %v749_v11 = vadd.f32 %v717_v35, %v1812_v2  ;;  %v872_v48 = vmul.f32 %v840_v15, %v744_v43  ;;  %v2019_v43 = vld [vmem:[#allocation7_spill] sm:$0xff] }
 0x14c   : > { %935 = vadd.xlane.f32.xlu1 %v891_v3  ;;  %945 = vadd.xlane.f32.xlu2 %v896_v28  ;;  %v839_v61 = vmin.f32 %v807_v33, 6.0  ;;  %v796_v52 = vmax.f32 %v764_v31, 0.0  ;;  %v719_v38 = vmul.f32 %v1858_v51, %v1863_v56  ;;  %v905_v59 = vmul.f32 0.16666667, %v873_v22 }
 0x14d   : > { %947 = vadd.xlane.f32.xlu0 %v897_v24  ;;  %v842_v39 = vmin.f32 %v810_v20, 6.0  ;;  %v812_v24 = vmax.f32 %v780_v13, 0.0  ;;  %v781_v26 = vadd.f32 3.0, %v749_v11  ;;  %v718_v3 = vmul.f32 %v1858_v51, %v1913_v23 }
 0x14e   : > { %v871_v54 = vmul.f32 %v839_v61, %v743_v4  ;;  %v811_v4 = vmax.f32 %v779_v63, 0.0  ;;  %v904_v60 = vmul.f32 0.16666667, %v872_v48  ;;  %v765_v2 = vadd.f32 3.0, %v1889_v18 }
 0x14f   : > { %v874_v30 = vmul.f32 %v842_v39, %v746_v50  ;;  %v828_v28 = vmin.f32 %v796_v52, 6.0  ;;  %v844_v42 = vmin.f32 %v812_v24, 6.0  ;;  %v766_v41 = vadd.f32 3.0, %v1920_v12 }
 0x150   : > { %v903_v36 = vmul.f32 0.16666667, %v871_v54  ;;  %v843_v9 = vmin.f32 %v811_v4, 6.0  ;;  %v750_v45 = vadd.f32 %v718_v3, %v1759_v49  ;;  %v813_v14 = vmax.f32 %v781_v26, 0.0 }
 0x151   : > { %v906_v46 = vmul.f32 0.16666667, %v874_v30  ;;  %v797_v57 = vmax.f32 %v765_v2, 0.0  ;;  %v751_v25 = vadd.f32 %v719_v38, %v2019_v43  ;;  %v860_v51 = vmul.f32 %v828_v28, %v1846_v6 }
 0x152   : > { %v875_v56 = vmul.f32 %v843_v9, %v747_v62  ;;  %v876_v23 = vmul.f32 %v844_v42, %v748_v44  ;;  %v798_v1 = vmax.f32 %v766_v41, 0.0  ;;  %v767_v50 = vadd.f32 3.0, %v1872_v27 }
 0x153   : > { %v845_v33 = vmin.f32 %v813_v14, 6.0  ;;  %v782_v53 = vadd.f32 3.0, %v750_v45  ;;  %v892_v32 = vmul.f32 0.16666667, %v860_v51  ;;  %v783_v0 = vadd.f32 3.0, %v751_v25 }
 0x154   : > { %949 = vadd.xlane.f32.xlu1 %v898_v55  ;;  %951 = vadd.xlane.f32.xlu2 %v899_v10  ;;  %v907_v40 = vmul.f32 0.16666667, %v875_v56  ;;  %v908_v16 = vmul.f32 0.16666667, %v876_v23  ;;  %v830_v55 = vmin.f32 %v798_v1, 6.0  ;;  %v799_v10 = vmax.f32 %v767_v50, 0.0 }
 0x155   : > { %953 = vadd.xlane.f32.xlu0 %v900_v8  ;;  %v829_v8 = vmin.f32 %v797_v57, 6.0  ;;  %v814_v19 = vmax.f32 %v782_v53, 0.0  ;;  %v877_v17 = vmul.f32 %v845_v33, %v749_v11  ;;  %v815_v61 = vmax.f32 %v783_v0, 0.0 }
 0x156   : > { %v862_v6 = vmul.f32 %v830_v55, %v1920_v12  ;;  %v831_v37 = vmin.f32 %v799_v10, 6.0  ;;  %v1009_v12 = vlaneseq }
 0x157   : > { %v861_v49 = vmul.f32 %v829_v8, %v1889_v18  ;;  %v846_v7 = vmin.f32 %v814_v19, 6.0  ;;  %v909_v62 = vmul.f32 0.16666667, %v877_v17  ;;  %v847_v5 = vmin.f32 %v815_v61, 6.0 }
 0x158   : > { %v894_v47 = vmul.f32 0.16666667, %v862_v6  ;;  %v863_v54 = vmul.f32 %v831_v37, %v1872_v27 }
 0x159   : > { %v893_v21 = vmul.f32 0.16666667, %v861_v49  ;;  %v878_v44 = vmul.f32 %v846_v7, %v750_v45  ;;  %v879_v20 = vmul.f32 %v847_v5, %v751_v25 }
 0x15a   : > { %v895_v35 = vmul.f32 0.16666667, %v863_v54 }
 0x15b   : > { %v910_v18 = vmul.f32 0.16666667, %v878_v44  ;;  %v911_v58 = vmul.f32 0.16666667, %v879_v20 }
 0x15c   : > { %955 = vadd.xlane.f32.xlu1 %v901_v29  ;;  %957 = vadd.xlane.f32.xlu2 %v902_v34  ;;  %v1954_v34 = vand.u32 127, %v1009_v12 }
 0x15d   : > { %959 = vadd.xlane.f32.xlu0 %v903_v36 }
 0x15e   : > { %v1016_v29 = vadd.s32 4294967280, %v1954_v34  ;;  %v1012_v15 = vadd.s32 4294967288, %v1954_v34  ;;  %v1020_v56 = vadd.s32 4294967272, %v1954_v34  ;;  %v1024_v25 = vadd.s32 4294967264, %v1954_v34 }
 0x15f   : > { %v1028_v23 = vadd.s32 4294967256, %v1954_v34  ;;  %v1040_v6 = vadd.s32 4294967232, %v1954_v34  ;;  %v1044_v20 = vadd.s32 4294967224, %v1954_v34 }
 0x164   : > { %961 = vadd.xlane.f32.xlu1 %v904_v60  ;;  %963 = vadd.xlane.f32.xlu2 %v905_v59 }
 0x165   : > { %965 = vadd.xlane.f32.xlu0 %v906_v46 }
 0x16c   : > { %967 = vadd.xlane.f32.xlu1 %v907_v40  ;;  %937 = vadd.xlane.f32.xlu2 %v892_v32 }
 0x16d   : > { %969 = vadd.xlane.f32.xlu0 %v908_v16  ;;  %v1032_v16 = vadd.s32 4294967248, %v1954_v34 }
 0x174   : > { %939 = vadd.xlane.f32.xlu1 %v893_v21  ;;  %971 = vadd.xlane.f32.xlu2 %v909_v62 }
 0x175   : > { %941 = vadd.xlane.f32.xlu0 %v894_v47  ;;  %v1036_v47 = vadd.s32 4294967240, %v1954_v34 }
 0x17c   : > { %973 = vadd.xlane.f32.xlu1 %v910_v18  ;;  %943 = vadd.xlane.f32.xlu2 %v895_v35 }
 0x17d   : > { %975 = vadd.xlane.f32.xlu0 %v911_v58 }
 0x187   : > { %v916_v63 = vpop.xlane.xlu1 %915 }
 0x188   : > { %v1013_v27 = vperm.slane %v916_v63, %v1012_v15  ;;  %v1052_v63 = vadd.s32 4294967208, %v1954_v34 }
 0x19e   : > { %v918_v36 = vpop.xlane.xlu2 %917 }
 0x19f   : > { %v1017_v39 = vperm.slane %v918_v36, %v1016_v29  ;;  %v914_v31 = vpop.xlane.xlu0 %913 }
 0x1a0   : > { %v1011_v13 = vperm.slane %v914_v31, %v1954_v34 }
 0x1a2   : > { %v1015_v11 = vsel %vm1014_vm0, %v1013_v27, %v1011_v13 }
 0x1a3   : > { %v1019_v22 = vsel %vm1018_vm1, %v1017_v39, %v1015_v11  ;;  %v1048_v11 = vadd.s32 4294967216, %v1954_v34 }
 0x1a7   : > { %v920_v48 = vpop.xlane.xlu2 %919  ;;  %v922_v4 = vpop.xlane.xlu0 %921 }
 0x1a8   : > { %v1021_v51 = vperm.slane %v920_v48, %v1020_v56  ;;  %v1025_v32 = vperm.slane %v922_v4, %v1024_v25  ;;  %v1056_v48 = vadd.s32 4294967200, %v1954_v34  ;;  %v1060_v4 = vadd.s32 4294967192, %v1954_v34 }
 0x1aa   : > { %v1023_v55 = vsel %vm1022_vm2, %v1021_v51, %v1019_v22 }
 0x1ab   : > { %v1027_v10 = vsel %vm1026_vm3, %v1025_v32, %v1023_v55 }
 0x1af   : > { %v924_v30 = vpop.xlane.xlu1 %923  ;;  %v926_v52 = vpop.xlane.xlu2 %925 }
 0x1b0   : > { %v928_v24 = vpop.xlane.xlu0 %927  ;;  %v1029_v0 = vperm.slane %v924_v30, %v1028_v23  ;;  %v1033_v61 = vperm.slane %v926_v52, %v1032_v16 }
 0x1b2   : > { %v1031_v62 = vsel %vm1030_vm4, %v1029_v0, %v1027_v10 }
 0x1b3   : > { %v1035_v18 = vsel %vm1034_vm5, %v1033_v61, %v1031_v62 }
 0x1b7   : > { %v1961_v38 = vpop.xlane.xlu1 %929  ;;  %v1963_v59 = vpop.xlane.xlu2 %931 }
 0x1b8   : > { %v1965_v26 = vpop.xlane.xlu0 %933  ;;  %v1041_v35 = vperm.slane %v1961_v38, %v1040_v6  ;;  %v1045_v39 = vperm.slane %v1963_v59, %v1044_v20 }
 0x1bf   : > { %v1967_v3 = vpop.xlane.xlu1 %935  ;;  %v946_v60 = vpop.xlane.xlu2 %945 }
 0x1c0   : > { %v948_v9 = vpop.xlane.xlu0 %947  ;;  %v1072_v14 = vperm.slane %v946_v60, %v1954_v34  ;;  %v1053_v60 = vperm.slane %v1967_v3, %v1052_v63 }
 0x1c1   : > { %v1073_v57 = vperm.slane %v948_v9, %v1012_v15 }
 0x1c3   : > { %v1074_v1 = vsel %vm1014_vm0, %v1073_v57, %v1072_v14 }
 0x1c7   : > { %v950_v2 = vpop.xlane.xlu1 %949  ;;  %v952_v46 = vpop.xlane.xlu2 %951 }
 0x1c8   : > { %v954_v28 = vpop.xlane.xlu0 %953  ;;  %v1075_v43 = vperm.slane %v950_v2, %v1016_v29  ;;  %v1077_v50 = vperm.slane %v952_v46, %v1020_v56  ;;  %v1037_v29 = vperm.slane %v928_v24, %v1036_v47  ;;  %v1049_v2 = vperm.slane %v1965_v26, %v1048_v11 }
 0x1c9   : > { %v1079_v17 = vperm.slane %v954_v28, %v1024_v25  ;;  %v1068_v25 = vadd.s32 4294967176, %v1954_v34 }
 0x1ca   : > { %v1076_v33 = vsel %vm1018_vm1, %v1075_v43, %v1074_v1  ;;  %v1039_v36 = vsel %vm1038_vm6, %v1037_v29, %v1035_v18 }
 0x1cb   : > { %v1078_v49 = vsel %vm1022_vm2, %v1077_v50, %v1076_v33  ;;  %v1043_v13 = vsel %vm1042_vm7, %v1041_v35, %v1039_v36 }
 0x1cc   : > { %v1080_v21 = vsel %vm1026_vm3, %v1079_v17, %v1078_v49  ;;  %v1047_v38 = vsel %vm1046_vm8, %v1045_v39, %v1043_v13  ;;  %v912_v49 = vld [vmem:[#allocation2] sm:$0x3] }
 0x1cf   : > { %v956_v42 = vpop.xlane.xlu1 %955  ;;  %v958_v41 = vpop.xlane.xlu2 %957 }
 0x1d0   : > { %v960_v45 = vpop.xlane.xlu0 %959  ;;  %v1081_v19 = vperm.slane %v956_v42, %v1028_v23  ;;  %v1083_v7 = vperm.slane %v958_v41, %v1032_v16  ;;  %v1064_v42 = vadd.s32 4294967184, %v1954_v34 }
 0x1d1   : > { %v1085_v15 = vperm.slane %v960_v45, %v1036_v47  ;;  %v1051_v45 = vsel %vm1050_vm9, %v1049_v2, %v1047_v38 }
 0x1d2   : > { %v1082_v37 = vsel %vm1030_vm4, %v1081_v19, %v1080_v21  ;;  %v1055_v57 = vsel %vm1054_vm10, %v1053_v60, %v1051_v45 }
 0x1d3   : > { %v1084_v58 = vsel %vm1034_vm5, %v1083_v7, %v1082_v37 }
 0x1d4   : > { %v1086_v31 = vsel %vm1038_vm6, %v1085_v15, %v1084_v58 }
 0x1d7   : > { %v962_v40 = vpop.xlane.xlu1 %961  ;;  %v964_v8 = vpop.xlane.xlu2 %963 }
 0x1d8   : > { %v966_v53 = vpop.xlane.xlu0 %965  ;;  %v1087_v12 = vperm.slane %v962_v40, %v1040_v6  ;;  %v1089_v27 = vperm.slane %v964_v8, %v1044_v20 }
 0x1d9   : > { %v1091_v46 = vperm.slane %v966_v53, %v1048_v11 }
 0x1da   : > { %v1088_v22 = vsel %vm1042_vm7, %v1087_v12, %v1086_v31 }
 0x1db   : > { %v1090_v59 = vsel %vm1046_vm8, %v1089_v27, %v1088_v22 }
 0x1dc   : > { %v1092_v56 = vsel %vm1050_vm9, %v1091_v46, %v1090_v59 }
 0x1df   : > { %v968_v5 = vpop.xlane.xlu1 %967  ;;  %v938_v44 = vpop.xlane.xlu2 %937 }
 0x1e0   : > { %v970_v54 = vpop.xlane.xlu0 %969  ;;  %v1093_v9 = vperm.slane %v968_v5, %v1052_v63  ;;  %v1057_v28 = vperm.slane %v938_v44, %v1056_v48 }
 0x1e1   : > { %v1095_v14 = vperm.slane %v970_v54, %v1056_v48 }
 0x1e2   : > { %v1094_v43 = vsel %vm1054_vm10, %v1093_v9, %v1092_v56  ;;  %v1059_v51 = vsel %vm1058_vm11, %v1057_v28, %v1055_v57 }
 0x1e3   : > { %v1096_v50 = vsel %vm1058_vm11, %v1095_v14, %v1094_v43 }
 0x1e7   : > { %v940_v30 = vpop.xlane.xlu1 %939  ;;  %v972_v52 = vpop.xlane.xlu2 %971 }
 0x1e8   : > { %v942_v24 = vpop.xlane.xlu0 %941  ;;  %v1061_v41 = vperm.slane %v940_v30, %v1060_v4  ;;  %v1097_v3 = vperm.slane %v972_v52, %v1060_v4 }
 0x1e9   : > { %v1065_v23 = vperm.slane %v942_v24, %v1064_v42 }
 0x1ea   : > { %v1063_v26 = vsel %vm1062_vm12, %v1061_v41, %v1059_v51  ;;  %v1098_v53 = vsel %vm1062_vm12, %v1097_v3, %v1096_v50 }
 0x1eb   : > { %v1067_v55 = vsel %vm1066_vm13, %v1065_v23, %v1063_v26 }
 0x1ef   : > { %v974_v1 = vpop.xlane.xlu1 %973  ;;  %v944_v40 = vpop.xlane.xlu2 %943 }
 0x1f0   : > { %v1099_v33 = vperm.slane %v974_v1, %v1064_v42  ;;  %v976_v8 = vpop.xlane.xlu0 %975  ;;  %v1069_v32 = vperm.slane %v944_v40, %v1068_v25 }
 0x1f1   : > { %v1101_v16 = vperm.slane %v976_v8, %v1068_v25 }
 0x1f2   : > { %v1100_v0 = vsel %vm1066_vm13, %v1099_v33, %v1098_v53  ;;  %v1071_v19 = vsel %vm1070_vm14, %v1069_v32, %v1067_v55 }
 0x1f3   : > { %v1102_v17 = vsel %vm1070_vm14, %v1101_v16, %v1100_v0  ;;  %1111 = sbr.rel (%p1191_p10) target bundleno = 516 (0x204), region = 81 }
 0x1f4   : > { %v1104_v34 = vsel %vm1103_vm15, %v1102_v17, %v1071_v19 }
 0x1f5   : > { %v1106_v6 = vadd.f32 %v1104_v34, %v912_v49 }
 0x1f7   : > { %1107 = vst [vmem:[#allocation2] sm:$0x3] %v1106_v6 }
 0x1fe   : > { %v1112_v10 = vld [vmem:[#allocation2] sm:$0x3] }
 0x1ff   : > { %v1113_v61 = vmul.f32 0.00390625, %v1112_v10 }
 0x201   : > { %v1114_v21 = vpack.c.bf16 %v1113_v61, %v1113_v61 }
 0x203   : > { %1115 = vst [vmem:[#allocation4] sm:$0x1] %v1114_v21 }
 0x204 PF: > { %p1200_p11 = scmp.eq.s32.totalorder %s1183_s17, 1  ;;  %s1125_s22 = sshll.u32 %s2017_s3, 4  ;;  %s1126_s22 = int_to_ptr.hbm [resolvable:$true] %s1125_s22 }
 0x205   : > { %s1332_s23 = smov [#allocation4]  }
 0x206   : > { %s1123_s24 = sshll.u32 %s1332_s23, 4  ;;  %s1124_s24 = int_to_ptr.vmem [resolvable:$true] %s1123_s24 }
 0x207   : > { %1197 = dma.vmem_to_hbm [thread:$0]  (%p1200_p11), %s1124_s24, 16, %s1126_s22, [#allocation5]  }
 0x208   : > { %1305 = dma.done.wait (%p1200_p11), [#allocation5], 16  }
 0x209   : > { %1307 = vsyncadd (%p1200_p11), [#allocation5], 4294967280 }
 0x20a PF: > { %s14_s16 = sadd.s32 1, %s1326_s16   ;;  %s2020_s12 = smov %s1314_s13 }
 0x20b   : > { %p11_p12 = scmp.ge.s32.totalorder %s14_s16, 4   ;;  %s2021_s13 = smov %s1389_s21 }
 0x20c   : > { %s2022_s14 = smov %s1322_s15  ;;  %s2023_s15 = smov %s2025_s18 }
 0x20d   :  { %13 = sbr.rel (!%p11_p12) target bundleno = 3 (0x3), region = 114 }
 0x212   :  { %1139 = vsyncpa [#allocation5], 1 }
 0x213   :  { %1141 = vsyncpa [#allocation5 + $0x1], 1 }

</bundles_post_ra>
